<compile_context>
chip_gen: v6e
topology: v6e:2x2x1
jax: 0.10.0
libtpu: 0.0.40
codegen_flags: <defaults>
</compile_context>

<pallas_src>
import jax
import jax.numpy as jnp
from jax.experimental import pallas as pl
from jax.experimental.pallas import tpu as pltpu


_BLOCK_ROWS_MAX = 4096      # packed rows per grid step (= 32768 samples at D_in=16)
_SPLIT_MIN_ROWS = 1024      # if one tile would cover >= this many rows, use >=2
                            # grid steps so both v7x TensorCores get work


def _round_up(a, b):
    return (a + b - 1) // b * b


def _block_diag(w, reps):
    """[a, b] -> [reps*a, reps*b] with `w` repeated along the block diagonal."""
    a, b = w.shape
    eye = jnp.eye(reps, dtype=w.dtype)
    return (eye[:, None, :, None] * w[None, :, None, :]).reshape(reps * a, reps * b)


def _quadratic_net_kernel(xp_ref, w1p_ref, w2p_ref, op_ref):
    # hp = xp @ W1p -> [rows_blk, pack*H]; MXU matmul, f32 accumulation.
    hp = jnp.dot(xp_ref[...], w1p_ref[...], preferred_element_type=jnp.float32)
    # Square on the VPU in f32 (v5e has no bf16 VPU support).
    hp2 = hp * hp
    # yp = hp^2 @ W2p -> [rows_blk, pack*D_out]; W2p stays f32.
    yp = jnp.dot(hp2, w2p_ref[...], preferred_element_type=jnp.float32)
    op_ref[...] = yp.astype(op_ref.dtype)


def quadratic_net(x, w_hidden, w_output, *, block_rows=None, stream_dtype=None):
    """QuadraticNet forward: ((x @ W1.T) ** 2) @ W2.T.

    x:        [N, D_in]
    w_hidden: [H, D_in]    (nn.Linear(D_in, H, bias=False).weight)
    w_output: [D_out, H]   (nn.Linear(H, D_out, bias=False).weight)
    block_rows: packed rows (each row = `pack` samples) streamed per grid step.
    stream_dtype: optional dtype for the streamed x / W1 (e.g. jnp.bfloat16).
      NOTE: casting f32 x here costs one extra HBM pass over x; prefer passing
      x already in the streaming dtype (the kernel streams x.dtype by default).
    """
    n, d_in = x.shape
    h_dim, d_in2 = w_hidden.shape
    d_out, h_dim2 = w_output.shape
    assert d_in2 == d_in and h_dim2 == h_dim

    out_dtype = x.dtype

    # Samples packed per 128-lane row: 8 for D_in=16 -> fully lane-dense blocks.
    pack = max(1, 128 // d_in)
    row_w_in = pack * d_in
    row_w_hid = pack * h_dim
    row_w_out = pack * d_out

    rows = -(-n // pack)                        # packed rows needed for n samples

    # --- batch tiling (in packed rows) ---
    if block_rows is None:
        if rows >= _SPLIT_MIN_ROWS:
            # >=2 grid steps so v7x's two TensorCores both stream HBM.
            block_rows = min(_BLOCK_ROWS_MAX, _round_up(-(-rows // 2), 8))
        else:
            block_rows = rows                   # single exact tile
    if block_rows >= rows:
        block_rows = rows                       # block == full array: no padding
        rows_padded = rows
    else:
        block_rows = _round_up(block_rows, 8)   # sublane-aligned when gridded
        rows_padded = _round_up(rows, block_rows)
    num_tiles = rows_padded // block_rows

    # --- pack x: [n, d_in] -> [rows_padded, pack*d_in] ---
    # When n == rows_padded*pack this reshape is a free row-major view (zero
    # HBM traffic). Ragged batches are padded (one copy of x); keep N a
    # multiple of the tile for the copy-free hot path.
    n_full = rows_padded * pack
    if n_full != n:
        x = jnp.pad(x, ((0, n_full - n), (0, 0)))
    xp = x.reshape(rows_padded, row_w_in)
    if stream_dtype is not None:
        xp = xp.astype(stream_dtype)            # explicit opt-in (extra HBM pass)

    # --- packed block-diagonal weights (tiny; VMEM-resident across the grid) ---
    w1p = _block_diag(w_hidden.T, pack).astype(xp.dtype)       # [pack*D_in, pack*H]
    w2p = _block_diag(w_output.T, pack).astype(jnp.float32)    # [pack*H, pack*D_out]

    x_index = lambda i: (i, 0)
    x_spec = pl.BlockSpec((block_rows, row_w_in), x_index)
    if num_tiles >= 3:
        try:    # deeper input buffering to hide DMA jitter on short steps
            x_spec = pl.BlockSpec((block_rows, row_w_in), x_index,
                                  pipeline_mode=pl.Buffered(3))
        except (TypeError, AttributeError):
            pass  # older API without pipeline_mode: default double-buffering

    flops = n_full * (2 * d_in * h_dim + h_dim + 2 * h_dim * d_out)
    bytes_accessed = (xp.size * xp.dtype.itemsize
                      + rows_padded * row_w_out * out_dtype.itemsize
                      + w1p.size * w1p.dtype.itemsize
                      + w2p.size * w2p.dtype.itemsize)

    yp = pl.pallas_call(
        _quadratic_net_kernel,
        out_shape=jax.ShapeDtypeStruct((rows_padded, row_w_out), out_dtype),
        grid=(num_tiles,),
        in_specs=[
            x_spec,                                                   # streamed x
            pl.BlockSpec((row_w_in, row_w_hid), lambda i: (0, 0)),    # W1p resident
            pl.BlockSpec((row_w_hid, row_w_out), lambda i: (0, 0)),   # W2p resident
        ],
        out_specs=pl.BlockSpec((block_rows, row_w_out), lambda i: (i, 0)),
        compiler_params=pltpu.CompilerParams(
            dimension_semantics=("parallel",),       # v7x: shard rows over 2 TCs
            vmem_limit_bytes=32 * 1024 * 1024),      # v5e: raise 16 MiB default
        cost_estimate=pl.CostEstimate(flops=flops, transcendentals=0,
                                      bytes_accessed=bytes_accessed),
    )(xp, w1p, w2p)

    # Free row-major reshape back to [N, D_out]; slice only if we padded.
    y = yp.reshape(n_full, d_out)
    if n_full != n:
        y = y[:n]
    return y


def reference(x, w_hidden, w_output):
    h = x @ w_hidden.T
    return (h * h) @ w_output.T


if __name__ == "__main__":
    # Small shapes consistent with the module: D_in=16, H=32, D_out=4, batch=8.
    N, D_in, H, D_out = 8, 16, 32, 4

    key = jax.random.PRNGKey(0)
    kx, kw1, kw2 = jax.random.split(key, 3)

    x = jax.random.normal(kx, (N, D_in), dtype=jnp.float32)
    w_hidden = jax.random.normal(kw1, (H, D_in), dtype=jnp.float32) * 0.1
    w_output = jax.random.normal(kw2, (D_out, H), dtype=jnp.float32) * 0.1

    # Single-tile, copy-free path (N is a multiple of the packing factor 8).
    y = jax.block_until_ready(quadratic_net(x, w_hidden, w_output))
    assert y.shape == (N, D_out)
    assert jnp.allclose(y, reference(x, w_hidden, w_output), atol=1e-4, rtol=1e-4), \
        "mismatch vs reference (single-tile path)"

    # Multi-tile grid + ragged batch (internally padded; aligned batches are copy-free).
    x2 = jax.random.normal(jax.random.fold_in(kx, 1), (300, D_in), dtype=jnp.float32)
    y2 = jax.block_until_ready(quadratic_net(x2, w_hidden, w_output, block_rows=16))
    assert y2.shape == (300, D_out)
    assert jnp.allclose(y2, reference(x2, w_hidden, w_output), atol=1e-4, rtol=1e-4), \
        "mismatch vs reference (gridded path)"

    # bf16-streamed path (HBM saver on v6e/v7x when activations are already bf16).
    y3 = jax.block_until_ready(
        quadratic_net(x2, w_hidden, w_output, block_rows=16,
                      stream_dtype=jnp.bfloat16))
    assert y3.shape == (300, D_out)
    assert jnp.allclose(y3, reference(x2, w_hidden, w_output), atol=5e-2, rtol=5e-2), \
        "mismatch vs reference (bf16-streamed path)"

    print("KERNEL_OK")
</pallas_src>

<mosaic_0001>
module attributes {stable_mosaic.version = 11 : i64} {
  func.func @_quadratic_net_kernel(%arg0: i32, %arg1: memref<1x128xf32, #tpu.memory_space<vmem>>, %arg2: memref<128x256xf32, #tpu.memory_space<vmem>>, %arg3: memref<256x32xf32, #tpu.memory_space<vmem>>, %arg4: memref<1x32xf32, #tpu.memory_space<vmem>>) attributes {dimension_semantics = [#tpu.dimension_semantics<parallel>], iteration_bounds = array<i64: 1>, scalar_prefetch = 0 : i64, scratch_operands = 0 : i64, tpu.core_type = #tpu.core_type<tc>, window_params = [{transform_indices = @transform_0, window_bounds = array<i64: 1, 128>}, {pipeline_mode = #tpu.pipeline_mode<synchronous>, transform_indices = @transform_1, window_bounds = array<i64: 128, 256>}, {pipeline_mode = #tpu.pipeline_mode<synchronous>, transform_indices = @transform_2, window_bounds = array<i64: 256, 32>}, {transform_indices = @transform_3, window_bounds = array<i64: 1, 32>}]} {
    %c0 = arith.constant 0 : index
    %c0_0 = arith.constant 0 : index
    %0 = vector.load %arg1[%c0, %c0_0] : memref<1x128xf32, #tpu.memory_space<vmem>>, vector<1x128xf32>
    %c0_1 = arith.constant 0 : index
    %c0_2 = arith.constant 0 : index
    %1 = vector.load %arg2[%c0_1, %c0_2] : memref<128x256xf32, #tpu.memory_space<vmem>>, vector<128x256xf32>
    %cst = arith.constant dense<0.000000e+00> : vector<1x256xf32>
    %2 = tpu.matmul %0, %1, %cst {dimension_numbers = #tpu.dot_dimension_numbers<[1], [0], [0], [1], [0, 0, 1, 1], [], []>} : vector<1x128xf32>, vector<128x256xf32>, vector<1x256xf32> -> vector<1x256xf32>
    %3 = arith.mulf %2, %2 : vector<1x256xf32>
    %c0_3 = arith.constant 0 : index
    %c0_4 = arith.constant 0 : index
    %4 = vector.load %arg3[%c0_3, %c0_4] : memref<256x32xf32, #tpu.memory_space<vmem>>, vector<256x32xf32>
    %cst_5 = arith.constant dense<0.000000e+00> : vector<1x32xf32>
    %5 = tpu.matmul %3, %4, %cst_5 {dimension_numbers = #tpu.dot_dimension_numbers<[1], [0], [0], [1], [0, 0, 1, 1], [], []>} : vector<1x256xf32>, vector<256x32xf32>, vector<1x32xf32> -> vector<1x32xf32>
    %c0_6 = arith.constant 0 : index
    %c0_7 = arith.constant 0 : index
    %6 = vector.load %arg4[%c0_6, %c0_7] : memref<1x32xf32, #tpu.memory_space<vmem>>, vector<1x32xf32>
    tpu.vector_store %arg4[%c0_6, %c0_7], %5 {strides = array<i32>} : memref<1x32xf32, #tpu.memory_space<vmem>>, vector<1x32xf32>,
    return
  }
  func.func @transform_0(%arg0: i32) -> (i32, i32) {
    %c0_i32 = arith.constant 0 : i32
    %c0_i32_0 = arith.constant 0 : i32
    return %arg0, %c0_i32 : i32, i32
  }
  func.func @transform_1(%arg0: i32) -> (i32, i32) {
    %c0_i32 = arith.constant 0 : i32
    %c0_i32_0 = arith.constant 0 : i32
    %c0_i32_1 = arith.constant 0 : i32
    return %c0_i32, %c0_i32_0 : i32, i32
  }
  func.func @transform_2(%arg0: i32) -> (i32, i32) {
    %c0_i32 = arith.constant 0 : i32
    %c0_i32_0 = arith.constant 0 : i32
    %c0_i32_1 = arith.constant 0 : i32
    return %c0_i32, %c0_i32_0 : i32, i32
  }
  func.func @transform_3(%arg0: i32) -> (i32, i32) {
    %c0_i32 = arith.constant 0 : i32
    %c0_i32_0 = arith.constant 0 : i32
    return %arg0, %c0_i32 : i32, i32
  }
}

</mosaic_0001>

<bundles_post_ra>
// kernel: tpu_custom_call.1
= control target key start
LH: loop header
LB: loop body
LE: loop exit
PB: predicated region body
PF: predicated region fallthrough
CT: control target
= control target key end

     0   :  { %v298_v4 = vmov 0.0   ;;  %s518_s0 = inlined_call_operand.vmem [shape: f32[1,128], index: 0, kind: input, shape index: {}]   ;;  %s519_s1 = inlined_call_operand.vmem [shape: f32[128,256], index: 1, kind: input, shape index: {}]   ;;  %s520_s2 = inlined_call_operand.vmem [shape: f32[256,32], index: 2, kind: input, shape index: {}]   ;;  %s521_s3 = inlined_call_operand.hbm [shape: f32[1,32], index: 3, kind: output, shape index: {}]  }
   0x1   :  { %v47_v0 = vld [vmem:[%s519_s1 + $0xf8] sm:$0xff]  ;;  %v46_v1 = vld [vmem:[%s519_s1 + $0xf0] sm:$0xff]  ;;  %v45_v2 = vld [vmem:[%s519_s1 + $0xe8] sm:$0xff]  ;;  %112 = vmatprep.mubr.f32.mxu0 %v298_v4 }
   0x2   :  { %48 = vmatprep.subr.mxu0 %v47_v0  ;;  %v44_v3 = vld [vmem:[%s519_s1 + $0xe0] sm:$0xff]  ;;  %v43_v5 = vld [vmem:[%s519_s1 + $0xd8] sm:$0xff]  ;;  %v42_v6 = vld [vmem:[%s519_s1 + $0xd0] sm:$0xff] }
   0x3   :  { %49 = vmatpush1.msra.mxu0 %v46_v1  ;;  %v41_v7 = vld [vmem:[%s519_s1 + $0xc8] sm:$0xff]  ;;  %v40_v8 = vld [vmem:[%s519_s1 + $0xc0] sm:$0xff]  ;;  %v39_v9 = vld [vmem:[%s519_s1 + $0xb8] sm:$0xff] }
   0x4   :  { %50 = vmatprep.subr.mxu0 %v45_v2  ;;  %v38_v10 = vld [vmem:[%s519_s1 + $0xb0] sm:$0xff]  ;;  %v37_v11 = vld [vmem:[%s519_s1 + $0xa8] sm:$0xff]  ;;  %v36_v12 = vld [vmem:[%s519_s1 + $0xa0] sm:$0xff] }
   0x5   :  { %51 = vmatpush1.msra.mxu0 %v44_v3  ;;  %v35_v13 = vld [vmem:[%s519_s1 + $0x98] sm:$0xff]  ;;  %v34_v14 = vld [vmem:[%s519_s1 + $0x90] sm:$0xff]  ;;  %v33_v18 = vld [vmem:[%s519_s1 + $0x88] sm:$0xff] }
   0x6   :  { %52 = vmatprep.subr.mxu0 %v43_v5  ;;  %v152_v15 = vld [vmem:[%s520_s2 + $0xf8] sm:$0xff]  ;;  %v151_v17 = vld [vmem:[%s520_s2 + $0xf0] sm:$0xff]  ;;  %v32_v20 = vld [vmem:[%s519_s1 + $0x80] sm:$0xff] }
   0x7   :  { %53 = vmatpush1.msra.mxu0 %v42_v6  ;;  %v136_v16 = vld [vmem:[%s520_s2 + $0x78] sm:$0xff]  ;;  %239 = vmatprep.subr.mxu1 %v152_v15  ;;  %v135_v19 = vld [vmem:[%s520_s2 + $0x70] sm:$0xff]  ;;  %v150_v21 = vld [vmem:[%s520_s2 + $0xe8] sm:$0xff] }
   0x8   :  { %54 = vmatprep.subr.mxu0 %v41_v7  ;;  %240 = vmatpush3.msra.mxu1 %v136_v16  ;;  %v31_v22 = vld [vmem:[%s519_s1 + $0x78] sm:$0xff]  ;;  %v134_v23 = vld [vmem:[%s520_s2 + $0x68] sm:$0xff]  ;;  %v30_v24 = vld [vmem:[%s519_s1 + $0x70] sm:$0xff] }
   0x9   :  { %55 = vmatpush1.msra.mxu0 %v40_v8  ;;  %241 = vmatprep.subr.mxu1 %v151_v17  ;;  %v149_v25 = vld [vmem:[%s520_s2 + $0xe0] sm:$0xff]  ;;  %v29_v26 = vld [vmem:[%s519_s1 + $0x68] sm:$0xff]  ;;  %v148_v29 = vld [vmem:[%s520_s2 + $0xd8] sm:$0xff] }
   0xa   :  { %56 = vmatprep.subr.mxu0 %v39_v9  ;;  %242 = vmatpush3.msra.mxu1 %v135_v19  ;;  %v133_v27 = vld [vmem:[%s520_s2 + $0x60] sm:$0xff]  ;;  %v27_v30 = vld [vmem:[%s519_s1 + $0x58] sm:$0xff]  ;;  %v26_v32 = vld [vmem:[%s519_s1 + $0x50] sm:$0xff] }
   0xb   :  { %57 = vmatpush1.msra.mxu0 %v38_v10  ;;  %243 = vmatprep.subr.mxu1 %v150_v21  ;;  %v28_v28 = vld [vmem:[%s519_s1 + $0x60] sm:$0xff]  ;;  %v132_v31 = vld [vmem:[%s520_s2 + $0x58] sm:$0xff]  ;;  %v147_v33 = vld [vmem:[%s520_s2 + $0xd0] sm:$0xff] }
   0xc   :  { %58 = vmatprep.subr.mxu0 %v37_v11  ;;  %244 = vmatpush3.msra.mxu1 %v134_v23 }
   0xd   :  { %59 = vmatpush1.msra.mxu0 %v36_v12  ;;  %245 = vmatprep.subr.mxu1 %v149_v25 }
   0xe   :  { %60 = vmatprep.subr.mxu0 %v35_v13  ;;  %246 = vmatpush3.msra.mxu1 %v133_v27 }
   0xf   :  { %61 = vmatpush1.msra.mxu0 %v34_v14 }
  0x10   :  { %62 = vmatprep.subr.mxu0 %v33_v18 }
  0x11   :  { %63 = vmatpush1.msra.mxu0 %v32_v20 }
  0x12   :  { %64 = vmatprep.subr.mxu0 %v31_v22 }
  0x13   :  { %65 = vmatpush1.msra.mxu0 %v30_v24 }
  0x14   :  { %66 = vmatprep.subr.mxu0 %v29_v26 }
  0x15   :  { %8 = vsyncpa [#allocation3], 0  ;;  %67 = vmatpush1.msra.mxu0 %v28_v28  ;;  %v25_v34 = vld [vmem:[%s519_s1 + $0x48] sm:$0xff]  ;;  %247 = vmatprep.subr.mxu1 %v148_v29  ;;  %v131_v35 = vld [vmem:[%s520_s2 + $0x50] sm:$0xff]  ;;  %s299_s5 = smov [#allocation2]   ;;  %vm223_vm0 = vcmask 253952  }
  0x16   :  { %68 = vmatprep.subr.mxu0 %v27_v30  ;;  %v24_v36 = vld [vmem:[%s519_s1 + $0x40] sm:$0xff]  ;;  %248 = vmatpush3.msra.mxu1 %v132_v31  ;;  %v146_v37 = vld [vmem:[%s520_s2 + $0xc8] sm:$0xff]  ;;  %v23_v38 = vld [vmem:[%s519_s1 + $0x38] sm:$0xff]  ;;  %s231_s6 = sshll.u32 %s299_s5, 4  ;;  %s232_s6 = int_to_ptr.vmem [resolvable:$true] %s231_s6 }
  0x17   :  { %69 = vmatpush1.msra.mxu0 %v26_v32  ;;  %249 = vmatprep.subr.mxu1 %v147_v33  ;;  %v130_v39 = vld [vmem:[%s520_s2 + $0x48] sm:$0xff]  ;;  %v22_v40 = vld [vmem:[%s519_s1 + $0x30] sm:$0xff]  ;;  %v145_v41 = vld [vmem:[%s520_s2 + $0xc0] sm:$0xff]  ;;  %s276_s7 = scalar_lea.vmem %s232_s6, 16  ;;  %s280_s8 = scalar_lea.vmem %s232_s6, 32 }
  0x18   :  { %70 = vmatprep.subr.mxu0 %v25_v34  ;;  %250 = vmatpush3.msra.mxu1 %v131_v35  ;;  %v21_v42 = vld [vmem:[%s519_s1 + $0x28] sm:$0xff]  ;;  %v129_v43 = vld [vmem:[%s520_s2 + $0x40] sm:$0xff]  ;;  %v144_v45 = vld [vmem:[%s520_s2 + $0xb8] sm:$0xff]  ;;  %p277_p0 = scmp.ne.s32.totalorder %s232_s6, %s276_s7  ;;  %p281_p1 = scmp.lt.s32.totalorder %s232_s6, %s232_s6 }
  0x19   :  { %71 = vmatpush1.msra.mxu0 %v24_v36  ;;  %251 = vmatprep.subr.mxu1 %v146_v37  ;;  %v20_v44 = vld [vmem:[%s519_s1 + $0x20] sm:$0xff]  ;;  %v19_v46 = vld [vmem:[%s519_s1 + $0x18] sm:$0xff]  ;;  %v18_v48 = vld [vmem:[%s519_s1 + $0x10] sm:$0xff]  ;;  %p282_p2 = scmp.lt.s32.totalorder %s280_s8, %s276_s7 }
  0x1a   :  { %72 = vmatprep.subr.mxu0 %v23_v38  ;;  %252 = vmatpush3.msra.mxu1 %v130_v39  ;;  %v128_v47 = vld [vmem:[%s520_s2 + $0x38] sm:$0xff]  ;;  %v143_v49 = vld [vmem:[%s520_s2 + $0xb0] sm:$0xff]  ;;  %v17_v50 = vld [vmem:[%s519_s1 + $0x8] sm:$0xff] }
  0x1b   :  { %73 = vmatpush1.msra.mxu0 %v22_v40  ;;  %253 = vmatprep.subr.mxu1 %v145_v41  ;;  %v127_v51 = vld [vmem:[%s520_s2 + $0x30] sm:$0xff]  ;;  %v16_v52 = vld [vmem:[%s519_s1] sm:$0xff]  ;;  %v142_v53 = vld [vmem:[%s520_s2 + $0xa8] sm:$0xff]  ;;  %p283_p3 = por %p282_p2, %p281_p1 }
  0x1c   :  { %74 = vmatprep.subr.mxu0 %v21_v42  ;;  %254 = vmatpush3.msra.mxu1 %v129_v43  ;;  %v15_v54 = vld [vmem:[%s518_s0] sm:$0x1]  ;;  %v126_v55 = vld [vmem:[%s520_s2 + $0x28] sm:$0xff]  ;;  %v140_v58 = vld [vmem:[%s520_s2 + $0x98] sm:$0xff] }
  0x1d   :  { %75 = vmatpush1.msra.mxu0 %v20_v44  ;;  %255 = vmatprep.subr.mxu1 %v144_v45  ;;  %v141_v56 = vld [vmem:[%s520_s2 + $0xa0] sm:$0xff]  ;;  %v124_v59 = vld [vmem:[%s520_s2 + $0x18] sm:$0xff]  ;;  %v139_v60 = vld [vmem:[%s520_s2 + $0x90] sm:$0xff]  ;;  %p284_p4 = pnand %p283_p3, %p277_p0 }
  0x1e   :  { %76 = vmatprep.subr.mxu0 %v19_v46  ;;  %256 = vmatpush3.msra.mxu1 %v128_v47  ;;  %v125_v57 = vld [vmem:[%s520_s2 + $0x20] sm:$0xff]  ;;  %v123_v61 = vld [vmem:[%s520_s2 + $0x10] sm:$0xff]  ;;  %v138_v62 = vld [vmem:[%s520_s2 + $0x88] sm:$0xff] }
  0x1f   :  { %77 = vmatpush1.msra.mxu0 %v18_v48  ;;  %257 = vmatprep.subr.mxu1 %v143_v49  ;;  %v122_v63 = vld [vmem:[%s520_s2 + $0x8] sm:$0xff]  ;;  %v137_v0 = vld [vmem:[%s520_s2 + $0x80] sm:$0xff] }
  0x20   :  { %78 = vmatprep.subr.mxu0 %v17_v50  ;;  %258 = vmatpush3.msra.mxu1 %v127_v51  ;;  %v121_v1 = vld [vmem:[%s520_s2] sm:$0xff] }
  0x21   :  { %79 = vmatpush1.msra.mxu0 %v16_v52  ;;  %259 = vmatprep.subr.mxu1 %v142_v53 }
  0x22   :  { %113 = vmatmul.mubr.f32.vlgmr.msra.gmra.mxu0 %v15_v54  ;;  %260 = vmatpush3.msra.mxu1 %v126_v55 }
  0x23   :  { %261 = vmatprep.subr.mxu1 %v141_v56 }
  0x24   :  { %262 = vmatpush3.msra.mxu1 %v125_v57 }
  0x25   :  { %263 = vmatprep.subr.mxu1 %v140_v58 }
  0x26   :  { %264 = vmatpush3.msra.mxu1 %v124_v59 }
  0x27   :  { %265 = vmatprep.subr.mxu1 %v139_v60 }
  0x28   :  { %266 = vmatpush3.msra.mxu1 %v123_v61 }
  0x29   :  { %267 = vmatprep.subr.mxu1 %v138_v62 }
  0x2a   :  { %268 = vmatpush3.msra.mxu1 %v122_v63 }
  0x2b   :  { %269 = vmatprep.subr.mxu1 %v137_v0 }
  0x2c   :  { %270 = vmatpush3.msra.mxu1 %v121_v1 }
  0xe2   :  { %v114_v2 = vpop.f32.mrf.mxu0 }
  0xe3   :  { %v119_v5 = vmul.f32 %v114_v2, %v114_v2 }
  0xe4   :  { %v116_v3 = vpop.f32.mrf.mxu0 }
  0xe5   :  { %v120_v4 = vmul.f32 %v116_v3, %v116_v3 }
  0xe7   :  { %217 = vmatprep.mubr.f32.mxu1 %v120_v4 }
  0xe8   :  { %218 = vmatmul.mubr.f32.vlgmr.msra.gmra.mxu1 %v119_v5 }
 0x1a8   :  { %v271_v6 = vpop.f32.mrf.mxu1 }
 0x1aa   :  { %v272_v7 = vpop.f32.mrf.mxu1 }
 0x1ab   :  { %v273_v8 = vadd.f32 %v272_v7, %v271_v6 }
 0x1ad   :  { %224 = vst.msk [vmem:[#allocation2] sm:$0x1] %vm223_vm0, %v273_v8 }
 0x1ae   :  { %287 = shalt.err (!%p284_p4)
}
 0x1af   :  { %234 = dma.vmem_to_hbm [thread:$0]  %s232_s6, 16, %s521_s3, [#allocation3]  }
 0x1b0   :  { %296 = dma.done.wait [#allocation3], 16  }
 0x1b1   :  { %297 = vsyncadd [#allocation3], 4294967280 }
 0x1b2   :  { %238 = vsyncpa [#allocation3], 1 }

</bundles_post_ra>
